<compile_context>
chip_gen: v6e
topology: v6e:2x2x1
jax: 0.10.0
libtpu: 0.0.40
codegen_flags: <defaults>
</compile_context>

<pallas_src>
import functools

import jax
import jax.numpy as jnp
from jax.experimental import pallas as pl
from jax.experimental.pallas import tpu as pltpu

_LANE = 128


def _round_up(x, m):
    return ((x + m - 1) // m) * m


# ----------------------------------------------------------------------------
# Kernel 1: fused object + body input projections (one call, two matmuls)
# ----------------------------------------------------------------------------
def _dual_proj_kernel(objs_ref, body_ref, wo_ref, bo_ref, wb_ref, bb_ref,
                      objs_out_ref, body_out_ref):
    objs_out_ref[...] = (
        jnp.dot(objs_ref[...], wo_ref[...], preferred_element_type=jnp.float32)
        + bo_ref[...]
    )
    body_out_ref[...] = (
        jnp.dot(body_ref[...], wb_ref[...], preferred_element_type=jnp.float32)
        + bb_ref[...]
    )


def dual_projection(objs_flat, body_flat, wo_t, bo, wb_t, bb):
    """objs_flat: [Mo, Fobj], body_flat: [Mb, Fbody].  Weights are pre-transposed
    and zero-padded to [F, Hp].  Returns lane-dense ([Mo, Hp], [Mb, Hp])."""
    mo = objs_flat.shape[0]
    mb = body_flat.shape[0]
    hp = wo_t.shape[1]
    return pl.pallas_call(
        _dual_proj_kernel,
        out_shape=(jax.ShapeDtypeStruct((mo, hp), jnp.float32),
                   jax.ShapeDtypeStruct((mb, hp), jnp.float32)),
    )(objs_flat, body_flat, wo_t, bo, wb_t, bb)


# ----------------------------------------------------------------------------
# Kernel 2: full stacked-LSTM recurrence in a single kernel invocation
# ----------------------------------------------------------------------------
def _lstm_stack_kernel(x_ref, w_ref, b_ref, o_ref, act_scr, c_scr, seq_scr, *,
                       t_len, num_layers, in_pad, hp, unroll):
    """
    x_ref:   [T, rows, in_pad]        layer-0 input (zero-padded to in_pad lanes)
    w_ref:   [L, in_pad + Hp, 4*Hp]   combined (w_ih | w_hh), transposed + padded
    b_ref:   [L, 1, 4*Hp]             combined bias (b_ih + b_hh), padded
    o_ref:   [rows, Hp]               final hidden state of the TOP layer only
    act_scr: [rows, in_pad + Hp]      (x_t | h_{t-1}) -> one merged gate matmul
    c_scr:   [rows, Hp]               cell state
    seq_scr: [T or 1, rows, Hp]       hidden sequence handed to the next layer
    """
    rows = act_scr.shape[0]
    for l in range(num_layers):                      # static Python loop
        # Reset recurrent state (PyTorch nn.LSTM default: h0 = c0 = 0).
        act_scr[...] = jnp.zeros_like(act_scr)
        c_scr[...] = jnp.zeros_like(c_scr)
        # Hoisted out of the time loop (JAX does not CSE broadcast_in_dim).
        bias = jnp.broadcast_to(b_ref[l], (rows, 4 * hp))

        def step(t, carry, l=l, bias=bias):
            if l == 0:
                act_scr[:, 0:in_pad] = x_ref[t]
            else:
                act_scr[:, 0:hp] = seq_scr[t]
            # Single MXU matmul produces all four gates (x and h terms merged).
            gates = jnp.dot(act_scr[...], w_ref[l],
                            preferred_element_type=jnp.float32) + bias
            # Gate slices are full 128-lane blocks (Hp is a lane multiple).
            i = jax.nn.sigmoid(gates[:, 0 * hp:1 * hp])
            f = jax.nn.sigmoid(gates[:, 1 * hp:2 * hp])
            g = jnp.tanh(gates[:, 2 * hp:3 * hp])
            o = jax.nn.sigmoid(gates[:, 3 * hp:4 * hp])
            c_new = f * c_scr[...] + i * g
            h_new = o * jnp.tanh(c_new)
            c_scr[...] = c_new
            act_scr[:, in_pad:in_pad + hp] = h_new
            if l < num_layers - 1:        # only non-top layers need the sequence
                seq_scr[t] = h_new
            return carry

        jax.lax.fori_loop(0, t_len, step, 0, unroll=unroll)

    o_ref[...] = act_scr[:, in_pad:in_pad + hp]


def lstm_stack_last_hidden(x, packed):
    """x: [T, rows, in_pad] -> last-timestep hidden of the top layer [rows, Hp]."""
    t_len, rows, width = x.shape
    in_pad, hp, layers = packed["in_pad"], packed["hp"], packed["layers"]
    assert width == in_pad, (width, in_pad)
    seq_t = t_len if layers > 1 else 1
    kernel = functools.partial(
        _lstm_stack_kernel, t_len=t_len, num_layers=layers, in_pad=in_pad,
        hp=hp, unroll=bool(t_len <= 32))
    return pl.pallas_call(
        kernel,
        out_shape=jax.ShapeDtypeStruct((rows, hp), jnp.float32),
        scratch_shapes=[
            pltpu.VMEM((rows, in_pad + hp), jnp.float32),   # (x_t | h) activation
            pltpu.VMEM((rows, hp), jnp.float32),            # cell state
            pltpu.VMEM((seq_t, rows, hp), jnp.float32),     # inter-layer h sequence
        ],
    )(x, packed["w"], packed["b"])


# ----------------------------------------------------------------------------
# Kernel 3: MLP head  sigmoid(relu(x W1^T + b1) W2^T + b2)
# ----------------------------------------------------------------------------
def _mlp_head_kernel(x_ref, w1t_ref, b1_ref, w2t_ref, b2_ref, o_ref):
    hid = jnp.maximum(
        jnp.dot(x_ref[...], w1t_ref[...], preferred_element_type=jnp.float32)
        + b1_ref[...], 0.0)
    logit = (jnp.dot(hid, w2t_ref[...], preferred_element_type=jnp.float32)
             + b2_ref[...])
    o_ref[...] = jax.nn.sigmoid(logit)


def mlp_head(x, w1t, b1, w2t, b2):
    rows = x.shape[0]
    return pl.pallas_call(
        _mlp_head_kernel,
        out_shape=jax.ShapeDtypeStruct((rows, 1), jnp.float32),
    )(x, w1t, b1, w2t, b2)


# ----------------------------------------------------------------------------
# One-time host-side weight packing (transpose / pad / combine)
# ----------------------------------------------------------------------------
def _pack_lstm_stack(layer_params, in_dim0, hidden):
    hp = _round_up(hidden, _LANE)
    in_pad = max(_round_up(in_dim0, _LANE), hp)
    num_layers = len(layer_params)
    w = jnp.zeros((num_layers, in_pad + hp, 4 * hp), jnp.float32)
    b = jnp.zeros((num_layers, 1, 4 * hp), jnp.float32)
    for l, (w_ih, w_hh, b_ih, b_hh) in enumerate(layer_params):
        d = w_ih.shape[1]                      # this layer's real input width
        bias = b_ih + b_hh
        for k in range(4):                     # PyTorch gate order: i, f, g, o
            w = w.at[l, 0:d, k * hp:k * hp + hidden].set(
                w_ih[k * hidden:(k + 1) * hidden, :].T)
            w = w.at[l, in_pad:in_pad + hidden, k * hp:k * hp + hidden].set(
                w_hh[k * hidden:(k + 1) * hidden, :].T)
            b = b.at[l, 0, k * hp:k * hp + hidden].set(
                bias[k * hidden:(k + 1) * hidden])
    return {"w": w, "b": b, "in_pad": in_pad, "hp": hp, "layers": num_layers}


def _pack_proj(w, bvec, hp):
    wt = jnp.zeros((w.shape[1], hp), jnp.float32).at[:, :w.shape[0]].set(w.T)
    bp = jnp.zeros((1, hp), jnp.float32).at[0, :w.shape[0]].set(bvec)
    return wt, bp


def pack_params(params):
    h = params["hidden_size"]
    hp = _round_up(h, _LANE)
    obj_wt, obj_b = _pack_proj(params["obj_w"], params["obj_b"], hp)
    body_wt, body_b = _pack_proj(params["body_w"], params["body_b"], hp)
    voc = params["lstm_lang"][0][0].shape[1]
    return {
        "hidden_size": h,
        "hp": hp,
        "obj_wt": obj_wt, "obj_b": obj_b,
        "body_wt": body_wt, "body_b": body_b,
        "lstm_obj": _pack_lstm_stack(params["lstm_obj"], h, h),
        "lstm_lang": _pack_lstm_stack(params["lstm_lang"], voc, h),
        "fc_w1t": params["fc_w1"].T,
        "fc_b1": params["fc_b1"].reshape(1, -1),
        "fc_w2t": params["fc_w2"].T,
        "fc_b2": params["fc_b2"].reshape(1, -1),
    }


# ----------------------------------------------------------------------------
# FactoredLSTM forward (glue in plain JAX, hot paths in Pallas)
# ----------------------------------------------------------------------------
def factored_lstm_forward(packed, objs_trace, body_trace, description):
    """
    objs_trace:  [B, T, Nobj, Fobj]
    body_trace:  [B, T, Nbody=1, Fbody]
    description: [B, Seq, Voc]
    returns sigmoid(logit): [B, 1]
    """
    B, T, Nobj, Fobj = objs_trace.shape
    _, _, Nbody, Fbody = body_trace.shape
    N = Nobj + Nbody
    h = packed["hidden_size"]
    hp = packed["hp"]

    # permute(1, 2, 0, 3): time-major, then flatten rows for the projections.
    objs = jnp.transpose(objs_trace, (1, 2, 0, 3)).astype(jnp.float32).reshape(-1, Fobj)
    body = jnp.transpose(body_trace, (1, 2, 0, 3)).astype(jnp.float32).reshape(-1, Fbody)

    objs_p, body_p = dual_projection(objs, body, packed["obj_wt"], packed["obj_b"],
                                     packed["body_wt"], packed["body_b"])
    # torch.cat([objs_p, body_p], dim=1).reshape(T, N*B, h), lane-padded to hp.
    state_trace = jnp.concatenate(
        [objs_p.reshape(T, Nobj, B, hp), body_p.reshape(T, Nbody, B, hp)], axis=1
    ).reshape(T, N * B, hp)

    # object/body LSTM stack -> last-timestep hidden of the top layer.
    h_state = lstm_stack_last_hidden(state_trace, packed["lstm_obj"])[:, :h]
    h_state = jnp.transpose(h_state.reshape(N, B, h), (1, 0, 2)).reshape(B, N * h)

    # language LSTM stack.
    desc = jnp.transpose(description, (1, 0, 2)).astype(jnp.float32)   # [Seq, B, Voc]
    in_pad_lang = packed["lstm_lang"]["in_pad"]
    desc = jnp.pad(desc, ((0, 0), (0, 0), (0, in_pad_lang - desc.shape[-1])))
    h_lang = lstm_stack_last_hidden(desc, packed["lstm_lang"])[:, :h]  # [B, h]

    h_cat = jnp.concatenate([h_state, h_lang], axis=-1)                # [B, (N+1)*h]
    return mlp_head(h_cat, packed["fc_w1t"], packed["fc_b1"],
                    packed["fc_w2t"], packed["fc_b2"])


# ----------------------------------------------------------------------------
# Deterministic parameter construction (PyTorch-layout) + pure-JAX reference
# ----------------------------------------------------------------------------
def make_params(key, *, body_size, obj_size, voc_size, hidden_size, num_layers):
    def nrm(k, shape, scale=0.1):
        return (scale * jax.random.normal(k, shape)).astype(jnp.float32)

    keys = iter(jax.random.split(key, 64))

    def lstm_params(in_dim):
        layers = []
        for l in range(num_layers):
            d = in_dim if l == 0 else hidden_size
            layers.append((
                nrm(next(keys), (4 * hidden_size, d)),            # w_ih
                nrm(next(keys), (4 * hidden_size, hidden_size)),  # w_hh
                nrm(next(keys), (4 * hidden_size,)),              # b_ih
                nrm(next(keys), (4 * hidden_size,)),              # b_hh
            ))
        return layers

    ff = hidden_size
    n_cat = (1 + 3 + 1) * hidden_size   # (Nobj=3 + body) * h + lang h
    return {
        "hidden_size": hidden_size,
        "obj_w": nrm(next(keys), (hidden_size, obj_size)),
        "obj_b": nrm(next(keys), (hidden_size,)),
        "body_w": nrm(next(keys), (hidden_size, body_size)),
        "body_b": nrm(next(keys), (hidden_size,)),
        "lstm_lang": lstm_params(voc_size),
        "lstm_obj": lstm_params(hidden_size),
        "fc_w1": nrm(next(keys), (ff, n_cat)),
        "fc_b1": nrm(next(keys), (ff,)),
        "fc_w2": nrm(next(keys), (1, ff)),
        "fc_b2": nrm(next(keys), (1,)),
    }


def _mm(a, b):
    return jnp.matmul(a, b, precision=jax.lax.Precision.HIGHEST)


def _reference_forward(params, objs_trace, body_trace, description):
    """Pure-JAX (XLA) reference mirroring the PyTorch module, for verification."""
    h = params["hidden_size"]
    B, T, Nobj, _ = objs_trace.shape
    N = Nobj + 1

    objs = jnp.transpose(objs_trace, (1, 2, 0, 3)).astype(jnp.float32)
    body = jnp.transpose(body_trace, (1, 2, 0, 3)).astype(jnp.float32)
    objs_p = _mm(objs, params["obj_w"].T) + params["obj_b"]
    body_p = _mm(body, params["body_w"].T) + params["body_b"]
    state = jnp.concatenate([objs_p, body_p], axis=1).reshape(T, N * B, h)

    def run_lstm(x, layers):
        for (w_ih, w_hh, b_ih, b_hh) in layers:
            rows = x.shape[1]
            hh = jnp.zeros((rows, h), jnp.float32)
            cc = jnp.zeros((rows, h), jnp.float32)
            outs = []
            for t in range(x.shape[0]):
                g = _mm(x[t], w_ih.T) + _mm(hh, w_hh.T) + b_ih + b_hh
                i = jax.nn.sigmoid(g[:, 0 * h:1 * h])
                f = jax.nn.sigmoid(g[:, 1 * h:2 * h])
                gg = jnp.tanh(g[:, 2 * h:3 * h])
                o = jax.nn.sigmoid(g[:, 3 * h:4 * h])
                cc = f * cc + i * gg
                hh = o * jnp.tanh(cc)
                outs.append(hh)
            x = jnp.stack(outs, axis=0)
        return x

    h_state = run_lstm(state, params["lstm_obj"])[-1].reshape(N, B, h)
    h_state = jnp.transpose(h_state, (1, 0, 2)).reshape(B, N * h)
    desc = jnp.transpose(description, (1, 0, 2)).astype(jnp.float32)
    h_lang = run_lstm(desc, params["lstm_lang"])[-1]
    h_cat = jnp.concatenate([h_state, h_lang], axis=-1)
    hid = jnp.maximum(_mm(h_cat, params["fc_w1"].T) + params["fc_b1"], 0.0)
    return jax.nn.sigmoid(_mm(hid, params["fc_w2"].T) + params["fc_b2"])


# ----------------------------------------------------------------------------
if __name__ == "__main__":
    B, T = 2, 8
    Nobj, Nbody = 3, 1          # module's fc_out assumes Nobj=3, Nbody=1
    obj_size, body_size = 6, 4
    voc_size, seq_len = 16, 8
    hidden_size, num_layers = 32, 1

    key = jax.random.PRNGKey(0)
    k_p, k_o, k_b, k_d = jax.random.split(key, 4)

    params = make_params(k_p, body_size=body_size, obj_size=obj_size,
                         voc_size=voc_size, hidden_size=hidden_size,
                         num_layers=num_layers)
    packed = pack_params(params)      # one-time weight transpose / pad / combine

    objs_trace = jax.random.normal(k_o, (B, T, Nobj, obj_size), jnp.float32)
    body_trace = jax.random.normal(k_b, (B, T, Nbody, body_size), jnp.float32)
    description = jax.random.normal(k_d, (B, seq_len, voc_size), jnp.float32)

    out = factored_lstm_forward(packed, objs_trace, body_trace, description)
    out = jax.block_until_ready(out)

    assert out.shape == (B, 1)
    assert bool(jnp.all(jnp.isfinite(out)))
    assert bool(jnp.all((out >= 0.0) & (out <= 1.0)))

    # Verify against a pure-JAX reference of the same module (f32).
    ref = _reference_forward(params, objs_trace, body_trace, description)
    max_err = float(jnp.max(jnp.abs(out - ref)))
    assert max_err < 5e-3, f"kernel/reference mismatch: max abs err {max_err}"

    print("KERNEL_OK")
</pallas_src>

<mosaic_0001>
module attributes {stable_mosaic.version = 11 : i64} {
  func.func @_dual_proj_kernel(%arg0: memref<48x6xf32, #tpu.memory_space<vmem>>, %arg1: memref<16x4xf32, #tpu.memory_space<vmem>>, %arg2: memref<6x128xf32, #tpu.memory_space<vmem>>, %arg3: memref<1x128xf32, #tpu.memory_space<vmem>>, %arg4: memref<4x128xf32, #tpu.memory_space<vmem>>, %arg5: memref<1x128xf32, #tpu.memory_space<vmem>>, %arg6: memref<48x128xf32, #tpu.memory_space<vmem>>, %arg7: memref<16x128xf32, #tpu.memory_space<vmem>>) attributes {dimension_semantics = [], scalar_prefetch = 0 : i64, scratch_operands = 0 : i64, tpu.core_type = #tpu.core_type<tc>} {
    %c0 = arith.constant 0 : index
    %c0_0 = arith.constant 0 : index
    %0 = vector.load %arg0[%c0, %c0_0] : memref<48x6xf32, #tpu.memory_space<vmem>>, vector<48x6xf32>
    %c0_1 = arith.constant 0 : index
    %c0_2 = arith.constant 0 : index
    %1 = vector.load %arg2[%c0_1, %c0_2] : memref<6x128xf32, #tpu.memory_space<vmem>>, vector<6x128xf32>
    %cst = arith.constant dense<0.000000e+00> : vector<48x128xf32>
    %2 = tpu.matmul %0, %1, %cst {dimension_numbers = #tpu.dot_dimension_numbers<[1], [0], [0], [1], [0, 0, 1, 1], [], []>} : vector<48x6xf32>, vector<6x128xf32>, vector<48x128xf32> -> vector<48x128xf32>
    %c0_3 = arith.constant 0 : index
    %c0_4 = arith.constant 0 : index
    %3 = vector.load %arg3[%c0_3, %c0_4] : memref<1x128xf32, #tpu.memory_space<vmem>>, vector<1x128xf32>
    %4 = vector.broadcast %3 : vector<1x128xf32> to vector<48x128xf32>
    %5 = arith.addf %2, %4 : vector<48x128xf32>
    %c0_5 = arith.constant 0 : index
    %c0_6 = arith.constant 0 : index
    %6 = vector.load %arg6[%c0_5, %c0_6] : memref<48x128xf32, #tpu.memory_space<vmem>>, vector<48x128xf32>
    tpu.vector_store %arg6[%c0_5, %c0_6], %5 {strides = array<i32>} : memref<48x128xf32, #tpu.memory_space<vmem>>, vector<48x128xf32>,
    %c0_7 = arith.constant 0 : index
    %c0_8 = arith.constant 0 : index
    %7 = vector.load %arg1[%c0_7, %c0_8] : memref<16x4xf32, #tpu.memory_space<vmem>>, vector<16x4xf32>
    %c0_9 = arith.constant 0 : index
    %c0_10 = arith.constant 0 : index
    %8 = vector.load %arg4[%c0_9, %c0_10] : memref<4x128xf32, #tpu.memory_space<vmem>>, vector<4x128xf32>
    %cst_11 = arith.constant dense<0.000000e+00> : vector<16x128xf32>
    %9 = tpu.matmul %7, %8, %cst_11 {dimension_numbers = #tpu.dot_dimension_numbers<[1], [0], [0], [1], [0, 0, 1, 1], [], []>} : vector<16x4xf32>, vector<4x128xf32>, vector<16x128xf32> -> vector<16x128xf32>
    %c0_12 = arith.constant 0 : index
    %c0_13 = arith.constant 0 : index
    %10 = vector.load %arg5[%c0_12, %c0_13] : memref<1x128xf32, #tpu.memory_space<vmem>>, vector<1x128xf32>
    %11 = vector.broadcast %10 : vector<1x128xf32> to vector<16x128xf32>
    %12 = arith.addf %9, %11 : vector<16x128xf32>
    %c0_14 = arith.constant 0 : index
    %c0_15 = arith.constant 0 : index
    %13 = vector.load %arg7[%c0_14, %c0_15] : memref<16x128xf32, #tpu.memory_space<vmem>>, vector<16x128xf32>
    tpu.vector_store %arg7[%c0_14, %c0_15], %12 {strides = array<i32>} : memref<16x128xf32, #tpu.memory_space<vmem>>, vector<16x128xf32>,
    return
  }
}

</mosaic_0001>

<bundles_post_ra>
// kernel: tpu_custom_call.1
= control target key start
LH: loop header
LB: loop body
LE: loop exit
PB: predicated region body
PF: predicated region fallthrough
CT: control target
= control target key end

     0   :  { %13 = vsyncpa [#allocation3], 0  ;;  %vm60_vm0 = vcmask 1045504   ;;  %vm41_vm1 = vcmask 48128   ;;  %vm182_vm2 = vcmask 1043456   ;;  %vm175_vm3 = vcmask 31744   ;;  %s475_s0 = inlined_call_operand.vmem [shape: f32[48,6], index: 0, kind: input, shape index: {}]   ;;  %s476_s1 = inlined_call_operand.vmem [shape: f32[16,4], index: 1, kind: input, shape index: {}]   ;;  %s477_s2 = inlined_call_operand.vmem [shape: f32[6,128], index: 2, kind: input, shape index: {}]   ;;  %s478_s3 = inlined_call_operand.vmem [shape: f32[1,128], index: 3, kind: input, shape index: {}]   ;;  %s479_s4 = inlined_call_operand.vmem [shape: f32[4,128], index: 4, kind: input, shape index: {}]   ;;  %s480_s5 = inlined_call_operand.vmem [shape: f32[1,128], index: 5, kind: input, shape index: {}]   ;;  %s481_s6 = inlined_call_operand.hbm [shape: f32[48,128], index: 6, kind: output, shape index: {0}]   ;;  %s482_s7 = inlined_call_operand.hbm [shape: f32[16,128], index: 7, kind: output, shape index: {1}]  }
   0x1   :  { %v33_v0 = vld [vmem:[%s477_s2] sm:$0x3f]  ;;  %v28_v3 = vld [vmem:[%s475_s0 + $0x8] sm:$0xff]  ;;  %v29_v6 = vld [vmem:[%s475_s0 + $0x10] sm:$0xff] }
   0x2   :  { %v27_v1 = vld [vmem:[%s475_s0] sm:$0xff]  ;;  %317 = vmatprep.subr.msk.mxu0 %vm60_vm0, %v33_v0  ;;  %333 = vmatprep.subr.msk.mxu1 %vm60_vm0, %v33_v0  ;;  %v32_v4 = vld [vmem:[%s475_s0 + $0x28] sm:$0xff] }
   0x3   :  { %v31_v2 = vld [vmem:[%s475_s0 + $0x20] sm:$0xff]  ;;  %318 = vmatpush3.msk.msra.mxu0 %vm60_vm0, %v33_v0  ;;  %334 = vmatpush3.msk.msra.mxu1 %vm60_vm0, %v33_v0 }
   0x4   :  { %v167_v5 = vld [vmem:[%s479_s4] sm:$0xf]  ;;  %319 = vmatprep.mubr.msk.f32.mxu0 %vm41_vm1, %v27_v1  ;;  %325 = vmatprep.mubr.msk.f32.mxu1 %vm41_vm1, %v31_v2 }
   0x5   :  { %v165_v7 = vld [vmem:[%s476_s1] sm:$0xff] }
   0x6   :  { %14 = vsyncpa [#allocation5], 0  ;;  %320 = vmatmul.mubr.msk.f32.vlgmr.msra.gmra.mxu0 %vm41_vm1, %v28_v3  ;;  %326 = vmatmul.mubr.msk.f32.vlgmr.msra.gmra.mxu1 %vm41_vm1, %v32_v4  ;;  %v30_v8 = vld [vmem:[%s475_s0 + $0x18] sm:$0xff]  ;;  %v166_v9 = vld [vmem:[%s476_s1 + $0x8] sm:$0xff]  ;;  %s383_s1 = smov [#allocation2]  }
   0x7   :  { %328 = vmatprep.subr.msk.mxu1 %vm182_vm2, %v167_v5  ;;  %322 = vmatprep.mubr.msk.f32.mxu0 %vm41_vm1, %v29_v6  ;;  %v295_v10 = vld [vmem:[%s478_s3] ss:$0 sm:$0xff]  ;;  %s268_s22 = sshll.u32 %s383_s1, 4  ;;  %s384_s3 = smov [#allocation4]   ;;  %s269_s22 = int_to_ptr.vmem [resolvable:$true] %s268_s22 }
   0x8   :  { %329 = vmatpush3.msk.msra.mxu1 %vm182_vm2, %v167_v5  ;;  %330 = vmatprep.mubr.msk.f32.mxu1 %vm175_vm3, %v165_v7  ;;  %v303_v17 = vld [vmem:[%s480_s5] ss:$0 sm:$0xff]  ;;  %s280_s23 = sshll.u32 %s384_s3, 4  ;;  %s339_s5 = scalar_lea.vmem %s269_s22, 768  ;;  %s281_s23 = int_to_ptr.vmem [resolvable:$true] %s280_s23 }
   0x9   :  { %p340_p0 = scmp.ne.s32.totalorder %s269_s22, %s339_s5  ;;  %p344_p1 = scmp.lt.s32.totalorder %s269_s22, %s269_s22 }
   0xa   :  { %323 = vmatmul.mubr.msk.f32.gmra.mxu0 %vm41_vm1, %v30_v8  ;;  %331 = vmatmul.mubr.msk.f32.vlgmr.msra.gmra.mxu1 %vm175_vm3, %v166_v9  ;;  %p345_p2 = scmp.lt.s32.totalorder %s339_s5, %s339_s5 }
   0xc   :  { %p346_p3 = por %p345_p2, %p344_p1 }
   0xe   :  { %p347_p4 = pnand %p346_p3, %p340_p0 }
  0xc6   :  { %v321_v11 = vpop.f32.mrf.mxu0  ;;  %v327_v12 = vpop.f32.mrf.mxu1 }
  0xc7   :  { %v136_v13 = vadd.f32 %v321_v11, %v295_v10  ;;  %v156_v14 = vadd.f32 %v327_v12, %v295_v10 }
  0xc8   :  { %v130_v15 = vpop.f32.mrf.mxu0  ;;  %v150_v16 = vpop.f32.mrf.mxu1 }
  0xc9   :  { %160 = vst [vmem:[#allocation2 + $0x8] sm:$0xff] %v136_v13  ;;  %164 = vst [vmem:[#allocation2 + $0x28] sm:$0xff] %v156_v14  ;;  %v131_v18 = vadd.f32 %v295_v10, %v130_v15  ;;  %v151_v19 = vadd.f32 %v295_v10, %v150_v16 }
  0xca   :  { %v324_v20 = vpop.f32.mrf.mxu0  ;;  %v332_v21 = vpop.f32.mrf.mxu1 }
  0xcb   :  { %159 = vst [vmem:[#allocation2] sm:$0xff] %v131_v18  ;;  %163 = vst [vmem:[#allocation2 + $0x20] sm:$0xff] %v151_v19  ;;  %v146_v22 = vadd.f32 %v324_v20, %v295_v10  ;;  %v258_v23 = vadd.f32 %v332_v21, %v303_v17 }
  0xcc   :  { %v140_v24 = vpop.f32.mrf.mxu0  ;;  %v252_v25 = vpop.f32.mrf.mxu1 }
  0xcd   :  { %162 = vst [vmem:[#allocation2 + $0x18] sm:$0xff] %v146_v22  ;;  %262 = vst [vmem:[#allocation4 + $0x8] sm:$0xff] %v258_v23  ;;  %v141_v26 = vadd.f32 %v295_v10, %v140_v24  ;;  %v253_v27 = vadd.f32 %v303_v17, %v252_v25 }
  0xcf   :  { %161 = vst [vmem:[#allocation2 + $0x10] sm:$0xff] %v141_v26  ;;  %261 = vst [vmem:[#allocation4] sm:$0xff] %v253_v27 }
  0xd0   :  { %350 = shalt.err (!%p347_p4)
}
  0xd1   :  { %s385_s24 = smov 128   ;;  %s386_s25 = smov 8  }
  0xd2   :  { %274 = dma.vmem_to_hbm [thread:$0]  %s269_s22, 768, %s481_s6, [#allocation3], %s385_s24, %s385_s24, %s386_s25  }
  0xd3   :  { %s359_s28 = scalar_lea.vmem %s281_s23, 256  ;;  %p364_p6 = scmp.lt.s32.totalorder %s281_s23, %s281_s23 }
  0xd4   :  { %p360_p5 = scmp.ne.s32.totalorder %s281_s23, %s359_s28  ;;  %p365_p7 = scmp.lt.s32.totalorder %s359_s28, %s359_s28 }
  0xd6   :  { %p366_p8 = por %p365_p7, %p364_p6 }
  0xd8   :  { %p367_p9 = pnand %p366_p8, %p360_p5 }
  0xda   :  { %370 = shalt.err (!%p367_p9)
}
  0xdb   :  { %286 = dma.vmem_to_hbm [thread:$0]  %s281_s23, 256, %s482_s7, [#allocation5], %s385_s24, %s385_s24, %s386_s25  }
  0xdc   :  { %379 = dma.done.wait [#allocation3], 768  }
  0xdd   :  { %380 = vsyncadd [#allocation3], 4294966528 }
  0xde   :  { %381 = dma.done.wait [#allocation5], 256  }
  0xdf   :  { %382 = vsyncadd [#allocation5], 4294967040 }
  0xe0   :  { %293 = vsyncpa [#allocation3], 1 }
  0xe1   :  { %294 = vsyncpa [#allocation5], 1 }

</bundles_post_ra>
